<compile_context>
chip_gen: v7x
topology: tpu7x:2x2x1
jax: 0.10.0
libtpu: 0.0.40
codegen_flags: <defaults>
</compile_context>

<pallas_src>
import jax
import jax.numpy as jnp
from jax.experimental import pallas as pl
from jax.experimental.pallas import tpu as pltpu


def _self_attn_kernel(x_ref, w1_ref, b1_ref, w2_ref, b2_ref, o_ref):
    # x_ref block: (Bt*S, H) rows of the wrapper-flattened input (natively 2-D).
    Bt, S = o_ref.shape

    # Linear(H, 32) + Tanh: one large 2-D MXU matmul (f32 accumulate), tanh on the EUP.
    h = jnp.tanh(
        jnp.dot(x_ref[...], w1_ref[...], preferred_element_type=jnp.float32)
        + b1_ref[...]                                        # (1, 32) broadcast
    )                                                        # (Bt*S, 32)

    # Linear(32, 1) as a VPU multiply + lane reduce against W2 held as a (1, 32) row.
    s = jnp.sum(h * w2_ref[...], axis=-1, keepdims=True) + b2_ref[...]   # (Bt*S, 1)

    # Regroup scores per batch row (tiny relayout: only Bt*S f32 values) and apply
    # softmax over the sequence axis (torch dim=1). Exact divide for accuracy.
    s = s.reshape(Bt, S)
    m = jnp.max(s, axis=-1, keepdims=True)
    e = jnp.exp(s - m)
    denom = jnp.sum(e, axis=-1, keepdims=True)
    o_ref[...] = (e / denom).astype(o_ref.dtype)


def _vmem_limit_bytes():
    """Explicit scoped-VMEM limit derived from the chip's physical VMEM."""
    try:
        phys = pltpu.get_tpu_info().vmem_capacity_bytes
    except Exception:
        phys = 64 * 1024 * 1024            # conservative fallback (v7x per-TensorCore)
    # Half of physical VMEM, clamped to [32 MiB, 96 MiB]:
    #   v5e/v6e (128 MiB physical) -> 64 MiB, v7x (64 MiB per TC) -> 32 MiB.
    return max(32 * 1024 * 1024, min(phys // 2, 96 * 1024 * 1024))


def _choose_batch_tile(B, S, H, itemsize, vmem_limit):
    """Pick how many batch rows (Bt) to fold into one grid step.

    Per batch row, per grid step (compute is f32 inside the kernel):
      x block (double-buffered by BlockSpec): 2 * S * H * itemsize
      h + tanh temporaries:                  ~2 * S * 32 * 4
      score / softmax temporaries:           ~6 * S * 4
      output block (double-buffered):         2 * S * 4
    """
    per_row = 2 * S * H * itemsize + 2 * S * 32 * 4 + 8 * S * 4
    usable = int(vmem_limit * 0.75)          # headroom for weights + compiler scratch
    cap = max(1, usable // max(per_row, 1))

    bt = min(B, cap)
    # Target >= 4 grid steps when the batch allows it, so v7x's two TensorCores each
    # pipeline >= 2 blocks (x DMA prologue hidden behind compute).
    if B >= 32:
        bt = min(bt, pl.cdiv(B, 4))
    if bt >= B:
        return B                             # single block: full-dim block is always legal
    if bt >= 8:
        return bt - (bt % 8)                 # output sublane (leading) dim: multiple of 8
    # One batch row (nearly) exceeds the budget: use the smallest legal tile and rely on
    # the explicit vmem_limit headroom.
    # TODO(synk): add a grid axis over S for very large S*H inputs.
    return min(B, 8)


def self_attention(lstm_output, w1, b1, w2, b2, *, batch_tile=None):
    """Pallas implementation of SelfAttention.forward.

    lstm_output: (B, S, H) float32
    w1: (H, 32), b1: (32,), w2: (32, 1), b2: (1,)
    returns: (B, S) attention weights (softmax over the sequence axis).
    """
    B, S, H = lstm_output.shape
    itemsize = jnp.dtype(lstm_output.dtype).itemsize
    vmem_limit = _vmem_limit_bytes()
    if batch_tile is None:
        batch_tile = _choose_batch_tile(B, S, H, itemsize, vmem_limit)
    Bt = int(batch_tile)

    # Free (metadata-only) collapse of the leading dims so the kernel's matmul operand
    # is a natively 2-D (Bt*S, H) block -- no in-kernel reshape copy of the big tile.
    x2d = lstm_output.reshape(B * S, H)
    b1_2d = b1.reshape(1, 32)
    w2_row = w2.reshape(1, 32)   # (32, 1) column -> (1, 32) row for the VPU reduce
    b2_2d = b2.reshape(1, 1)

    # NOTE: when B % Bt != 0 the ragged final block computes softmax over padded rows;
    # those output rows are masked on writeback, so results stay correct -- don't
    # "optimize" the ragged handling away.
    return pl.pallas_call(
        _self_attn_kernel,
        out_shape=jax.ShapeDtypeStruct((B, S), lstm_output.dtype),
        grid_spec=pltpu.PrefetchScalarGridSpec(
            num_scalar_prefetch=0,
            grid=(pl.cdiv(B, Bt),),
            in_specs=[
                pl.BlockSpec((Bt * S, H), lambda b: (b, 0)),    # Bt batch rows of x / step
                pl.BlockSpec((H, 32), lambda b: (0, 0)),        # W1 (whole, resident)
                pl.BlockSpec((1, 32), lambda b: (0, 0)),        # b1
                pl.BlockSpec((1, 32), lambda b: (0, 0)),        # W2 as a row
                pl.BlockSpec((1, 1), lambda b: (0, 0)),         # b2
            ],
            out_specs=pl.BlockSpec((Bt, S), lambda b: (b, 0)),  # lane-dense (Bt, S)
        ),
        compiler_params=pltpu.CompilerParams(
            dimension_semantics=("parallel",),
            vmem_limit_bytes=vmem_limit,
        ),
    )(x2d, w1, b1_2d, w2_row, b2_2d)


def _reference(lstm_output, w1, b1, w2, b2):
    hp = jax.lax.Precision.HIGHEST
    h = jnp.tanh(jnp.einsum("bsh,ho->bso", lstm_output, w1, precision=hp) + b1)
    s = jnp.einsum("bso,ol->bsl", h, w2, precision=hp) + b2    # (B, S, 1)
    w = jax.nn.softmax(s, axis=1)                              # softmax over seq dim
    return w[..., 0]                                           # squeeze(-1)


if __name__ == "__main__":
    key = jax.random.PRNGKey(0)
    B, S, H = 2, 8, 32   # batch, seq, hidden_size

    k_x, k_w1, k_b1, k_w2, k_b2 = jax.random.split(key, 5)
    x = jax.random.normal(k_x, (B, S, H), dtype=jnp.float32)

    # Deterministic parameter init (shapes from nn.Linear(H,32), nn.Linear(32,1))
    bound1 = 1.0 / jnp.sqrt(H)
    w1 = jax.random.uniform(k_w1, (H, 32), jnp.float32, -bound1, bound1)
    b1 = jax.random.uniform(k_b1, (32,), jnp.float32, -bound1, bound1)
    bound2 = 1.0 / jnp.sqrt(32.0)
    w2 = jax.random.uniform(k_w2, (32, 1), jnp.float32, -bound2, bound2)
    b2 = jax.random.uniform(k_b2, (1,), jnp.float32, -bound2, bound2)

    out = self_attention(x, w1, b1, w2, b2)
    out = jax.block_until_ready(out)

    ref = _reference(x, w1, b1, w2, b2)
    assert out.shape == (B, S), out.shape
    assert jnp.allclose(out, ref, atol=1e-4, rtol=1e-4), (out, ref)

    print("KERNEL_OK")
</pallas_src>

<mosaic_0001>
module attributes {stable_mosaic.version = 11 : i64} {
  func.func @_self_attn_kernel(%arg0: i32, %arg1: memref<16x32xf32, #tpu.memory_space<vmem>>, %arg2: memref<32x32xf32, #tpu.memory_space<vmem>>, %arg3: memref<1x32xf32, #tpu.memory_space<vmem>>, %arg4: memref<1x32xf32, #tpu.memory_space<vmem>>, %arg5: memref<1x1xf32, #tpu.memory_space<vmem>>, %arg6: memref<2x8xf32, #tpu.memory_space<vmem>>) attributes {dimension_semantics = [#tpu.dimension_semantics<parallel>], iteration_bounds = array<i64: 1>, scalar_prefetch = 0 : i64, scratch_operands = 0 : i64, tpu.core_type = #tpu.core_type<tc>, window_params = [{transform_indices = @transform_0, window_bounds = array<i64: 16, 32>}, {pipeline_mode = #tpu.pipeline_mode<synchronous>, transform_indices = @transform_1, window_bounds = array<i64: 32, 32>}, {pipeline_mode = #tpu.pipeline_mode<synchronous>, transform_indices = @transform_2, window_bounds = array<i64: 1, 32>}, {pipeline_mode = #tpu.pipeline_mode<synchronous>, transform_indices = @transform_3, window_bounds = array<i64: 1, 32>}, {pipeline_mode = #tpu.pipeline_mode<synchronous>, transform_indices = @transform_4, window_bounds = array<i64: 1, 1>}, {transform_indices = @transform_5, window_bounds = array<i64: 2, 8>}]} {
    %c0 = arith.constant 0 : index
    %c0_0 = arith.constant 0 : index
    %0 = vector.load %arg1[%c0, %c0_0] : memref<16x32xf32, #tpu.memory_space<vmem>>, vector<16x32xf32>
    %c0_1 = arith.constant 0 : index
    %c0_2 = arith.constant 0 : index
    %1 = vector.load %arg2[%c0_1, %c0_2] : memref<32x32xf32, #tpu.memory_space<vmem>>, vector<32x32xf32>
    %cst = arith.constant dense<0.000000e+00> : vector<16x32xf32>
    %2 = tpu.matmul %0, %1, %cst {dimension_numbers = #tpu.dot_dimension_numbers<[1], [0], [0], [1], [0, 0, 1, 1], [], []>} : vector<16x32xf32>, vector<32x32xf32>, vector<16x32xf32> -> vector<16x32xf32>
    %c0_3 = arith.constant 0 : index
    %c0_4 = arith.constant 0 : index
    %3 = vector.load %arg3[%c0_3, %c0_4] : memref<1x32xf32, #tpu.memory_space<vmem>>, vector<1x32xf32>
    %4 = vector.broadcast %3 : vector<1x32xf32> to vector<16x32xf32>
    %5 = arith.addf %2, %4 : vector<16x32xf32>
    %6 = math.tanh %5 : vector<16x32xf32>
    %c0_5 = arith.constant 0 : index
    %c0_6 = arith.constant 0 : index
    %7 = vector.load %arg4[%c0_5, %c0_6] : memref<1x32xf32, #tpu.memory_space<vmem>>, vector<1x32xf32>
    %8 = vector.broadcast %7 : vector<1x32xf32> to vector<16x32xf32>
    %9 = arith.mulf %6, %8 : vector<16x32xf32>
    %cst_7 = arith.constant dense<0.000000e+00> : vector<16xf32>
    %10 = vector.multi_reduction <add>, %9, %cst_7 [1] : vector<16x32xf32> to vector<16xf32>
    %11 = vector.shape_cast %10 : vector<16xf32> to vector<16x1xf32>
    %c0_8 = arith.constant 0 : index
    %c0_9 = arith.constant 0 : index
    %12 = vector.load %arg5[%c0_8, %c0_9] : memref<1x1xf32, #tpu.memory_space<vmem>>, vector<1x1xf32>
    %13 = vector.broadcast %12 : vector<1x1xf32> to vector<16x1xf32>
    %14 = arith.addf %11, %13 : vector<16x1xf32>
    %15 = vector.shape_cast %14 : vector<16x1xf32> to vector<2x8xf32>
    %cst_10 = arith.constant dense<0xFF800000> : vector<2xf32>
    %16 = vector.multi_reduction <maximumf>, %15, %cst_10 [1] : vector<2x8xf32> to vector<2xf32>
    %17 = vector.shape_cast %16 : vector<2xf32> to vector<2x1xf32>
    %18 = vector.broadcast %17 : vector<2x1xf32> to vector<2x8xf32>
    %19 = arith.subf %15, %18 : vector<2x8xf32>
    %20 = math.exp %19 : vector<2x8xf32>
    %cst_11 = arith.constant dense<0.000000e+00> : vector<2xf32>
    %21 = vector.multi_reduction <add>, %20, %cst_11 [1] : vector<2x8xf32> to vector<2xf32>
    %22 = vector.shape_cast %21 : vector<2xf32> to vector<2x1xf32>
    %23 = vector.broadcast %22 : vector<2x1xf32> to vector<2x8xf32>
    %24 = arith.divf %20, %23 : vector<2x8xf32>
    %c0_12 = arith.constant 0 : index
    %c0_13 = arith.constant 0 : index
    %25 = vector.load %arg6[%c0_12, %c0_13] : memref<2x8xf32, #tpu.memory_space<vmem>>, vector<2x8xf32>
    tpu.vector_store %arg6[%c0_12, %c0_13], %24 {strides = array<i32>} : memref<2x8xf32, #tpu.memory_space<vmem>>, vector<2x8xf32>,
    return
  }
  func.func @transform_0(%arg0: i32) -> (i32, i32) {
    %c0_i32 = arith.constant 0 : i32
    %c0_i32_0 = arith.constant 0 : i32
    return %arg0, %c0_i32 : i32, i32
  }
  func.func @transform_1(%arg0: i32) -> (i32, i32) {
    %c0_i32 = arith.constant 0 : i32
    %c0_i32_0 = arith.constant 0 : i32
    %c0_i32_1 = arith.constant 0 : i32
    return %c0_i32, %c0_i32_0 : i32, i32
  }
  func.func @transform_2(%arg0: i32) -> (i32, i32) {
    %c0_i32 = arith.constant 0 : i32
    %c0_i32_0 = arith.constant 0 : i32
    %c0_i32_1 = arith.constant 0 : i32
    return %c0_i32, %c0_i32_0 : i32, i32
  }
  func.func @transform_3(%arg0: i32) -> (i32, i32) {
    %c0_i32 = arith.constant 0 : i32
    %c0_i32_0 = arith.constant 0 : i32
    %c0_i32_1 = arith.constant 0 : i32
    return %c0_i32, %c0_i32_0 : i32, i32
  }
  func.func @transform_4(%arg0: i32) -> (i32, i32) {
    %c0_i32 = arith.constant 0 : i32
    %c0_i32_0 = arith.constant 0 : i32
    %c0_i32_1 = arith.constant 0 : i32
    return %c0_i32, %c0_i32_0 : i32, i32
  }
  func.func @transform_5(%arg0: i32) -> (i32, i32) {
    %c0_i32 = arith.constant 0 : i32
    %c0_i32_0 = arith.constant 0 : i32
    return %arg0, %c0_i32 : i32, i32
  }
}

</mosaic_0001>

<bundles_post_ra>
// kernel: tpu_custom_call.1
= control target key start
LH: loop header
LB: loop body
LE: loop exit
PB: predicated region body
PF: predicated region fallthrough
CT: control target
= control target key end

     0   :  { %s498_s0 = inlined_call_operand.hbm [shape: f32[16,32], index: 0, kind: input, shape index: {}]   ;;  %s499_s1 = inlined_call_operand.hbm [shape: f32[32,32], index: 1, kind: input, shape index: {}]   ;;  %s500_s2 = inlined_call_operand.vmem [shape: f32[1,32], index: 2, kind: input, shape index: {}]   ;;  %s501_s3 = inlined_call_operand.vmem [shape: f32[1,32], index: 3, kind: input, shape index: {}]   ;;  %s502_s4 = inlined_call_operand.<no memory space> [shape: f32[1,1], index: 4, kind: input, shape index: {}]   ;;  %s503_s5 = inlined_call_operand.hbm [shape: f32[2,8], index: 5, kind: output, shape index: {}]  }
   0x1   :  { %v10_v0 = vstv %s502_s4 }
   0x2   :  { %11 = vst [vmem:[#allocation2] sm:$0x1] %v10_v0 }
   0x3   :  { %12 = vsyncpa [#allocation4], 0 }
   0x4   :  { %13 = vsyncpa [#allocation7], 0 }
   0x5   :  { %14 = vsyncpa [#allocation5], 0  ;;  %s407_s20 = smov [#allocation3]   ;;  %s335_s24 = scalar_lea.hbm %s498_s0, 256 }
   0x6   :  { %s20_s21 = sshll.u32 %s407_s20, 4  ;;  %p336_p0 = scmp.ne.s32.totalorder %s498_s0, %s335_s24  ;;  %s21_s21 = int_to_ptr.vmem [resolvable:$true] %s20_s21 }
   0x7   :  { %p339_p1 = scmp.lt.u32.totalorder %s335_s24, %s498_s0 }
   0x9   :  { %p341_p2 = pnand %p339_p1, %p336_p0 }
   0xb   :  { %344 = shalt.err (!%p341_p2)
}
   0xc   :  { %s345_s4 = scalar_lea.vmem %s21_s21, 256  ;;  %p350_p4 = scmp.lt.s32.totalorder %s21_s21, %s21_s21 }
   0xd   :  { %p346_p3 = scmp.ne.s32.totalorder %s21_s21, %s345_s4  ;;  %p351_p5 = scmp.lt.s32.totalorder %s345_s4, %s345_s4 }
   0xf   :  { %p352_p6 = por %p351_p5, %p350_p4 }
  0x11   :  { %p353_p7 = pnand %p352_p6, %p346_p3 }
  0x13   :  { %356 = shalt.err (!%p353_p7)
}
  0x14   :  { %s408_s29 = smov 128   ;;  %s409_s30 = smov 8  }
  0x15   :  { %26 = dma.hbm_to_vmem [thread:$0]  %s498_s0, 256, %s21_s21, [#allocation4], %s408_s29, %s408_s29, %s409_s30  }
  0x16   :  { %s410_s8 = smov [#allocation6]   ;;  %s357_s12 = scalar_lea.hbm %s499_s1, 512 }
  0x17   :  { %s32_s9 = sshll.u32 %s410_s8, 4  ;;  %p358_p8 = scmp.ne.s32.totalorder %s499_s1, %s357_s12  ;;  %s33_s9 = int_to_ptr.vmem [resolvable:$true] %s32_s9 }
  0x18   :  { %p361_p9 = scmp.lt.u32.totalorder %s357_s12, %s499_s1 }
  0x1a   :  { %p363_p10 = pnand %p361_p9, %p358_p8 }
  0x1c   :  { %366 = shalt.err (!%p363_p10)
}
  0x1d   :  { %s367_s17 = scalar_lea.vmem %s33_s9, 512  ;;  %p372_p12 = scmp.lt.s32.totalorder %s33_s9, %s33_s9 }
  0x1e   :  { %p368_p11 = scmp.ne.s32.totalorder %s33_s9, %s367_s17  ;;  %p373_p13 = scmp.lt.s32.totalorder %s367_s17, %s367_s17 }
  0x20   :  { %p374_p0 = por %p373_p13, %p372_p12 }
  0x22   :  { %p375_p1 = pnand %p374_p0, %p368_p11 }
  0x24   :  { %378 = shalt.err (!%p375_p1)
}
  0x25   :  { %38 = dma.hbm_to_vmem [thread:$0]  %s499_s1, 512, %s33_s9, [#allocation7], %s408_s29, %s408_s29, %s409_s30  }
  0x26   :  { %401 = dma.done.wait [#allocation4], 256  }
  0x27   :  { %402 = vsyncadd [#allocation4], 4294967040 }
  0x28   :  { %403 = dma.done.wait [#allocation7], 512  }
  0x29   :  { %404 = vsyncadd [#allocation7], 4294966784  ;;  %vm64_vm0 = vcmask 261120   ;;  %v53_v1 = vld [vmem:[#allocation6] sm:$0xff]  ;;  %v54_v2 = vld [vmem:[#allocation6 + $0x8] sm:$0xff]  ;;  %v411_v21 = vmov 0   ;;  %v180_v27 = vlaneseq }
  0x2a   :  { %v55_v3 = vld [vmem:[#allocation6 + $0x10] sm:$0xff]  ;;  %v307_v4 = vpack.c.bf16 %v54_v2, %v53_v1  ;;  %v56_v5 = vld [vmem:[#allocation6 + $0x18] sm:$0xff]  ;;  %v285_v9 = vld [vmem:[%s500_s2] ss:$0 sm:$0xff]  ;;  %321 = vset.pattern.permute.xlu1 %v411_v21  ;;  %322 = vset.pattern.permute.xlu0 %v411_v21  ;;  %vm190_vm1 = vcmask 1041409   ;;  %vm193_vm2 = vcmask 58368  }
  0x2b   :  { %v51_v6 = vld [vmem:[#allocation3] sm:$0xff]  ;;  %v311_v7 = vpack.c.bf16 %v56_v5, %v55_v3  ;;  %v52_v8 = vld [vmem:[#allocation3 + $0x8] sm:$0xff]  ;;  %v288_v14 = vld [vmem:[%s501_s3] ss:$0 sm:$0xff]  ;;  %v181_v28 = vand.u32 127, %v180_v27  ;;  %v183_v29 = vshrl.u32 %v180_v27, 7 }
  0x2c   :  { %304 = vmatprep.mubr.msk.f32.mxu0 %vm64_vm0, %v51_v6  ;;  %308 = vmatprep.subr.bf16.mxu0 %v307_v4  ;;  %v289_v22 = vld [vmem:[#allocation2] ss:$0 sm:$0xff]  ;;  %s412_s2 = smov [#allocation8]  }
  0x2d   :  { %310 = vmatpush3.bf16.msra.mxu0 %v307_v4  ;;  %v184_v31 = vsub.s32 %v181_v28, %v183_v29  ;;  %v200_v37 = vsub.s32 0, %v183_v29  ;;  %v204_v38 = vsub.s32 1, %v183_v29  ;;  %s275_s3 = sshll.u32 %s412_s2, 4  ;;  %s276_s3 = int_to_ptr.vmem [resolvable:$true] %s275_s3 }
  0x2e   :  { %312 = vmatprep.subr.bf16.mxu0 %v311_v7  ;;  %s379_s22 = scalar_lea.vmem %s276_s3, 32  ;;  %p384_p3 = scmp.lt.s32.totalorder %s276_s3, %s276_s3 }
  0x2f   :  { %p380_p2 = scmp.ne.s32.totalorder %s276_s3, %s379_s22  ;;  %p385_p4 = scmp.lt.s32.totalorder %s379_s22, %s379_s22 }
  0x31   :  { %314 = vmatpush3.bf16.msra.mxu0 %v311_v7  ;;  %p386_p5 = por %p385_p4, %p384_p3 }
  0x33   :  { %p387_p6 = pnand %p386_p5, %p380_p2 }
  0x34   :  { %305 = vmatmul.mubr.msk.f32.vlgmr.msra.gmra.mrb[0].mxu0 %vm64_vm0, %v52_v8 }
 0x107   :  { %v306_v10 = vpop.f32.mrb[0].mxu0 }
 0x108   :  { %v143_v11 = vadd.f32 %v306_v10, %v285_v9  ;;  %v137_v12 = vpop.f32.mrb[1].mxu0 }
 0x109   :  { %v138_v13 = vadd.f32 %v285_v9, %v137_v12 }
 0x10a   :  { %323 = vtanh.f32 %v143_v11 }
 0x10b   :  { %325 = vtanh.f32 %v138_v13 }
 0x114   :  { %v324_v15 = vpop.eup %323 }
 0x115   :  { %v326_v16 = vpop.eup %325  ;;  %v156_v19 = vmul.f32 %v324_v15, %v288_v14 }
 0x116   :  { %v155_v17 = vmul.f32 %v326_v16, %v288_v14 }
 0x117   :  { %v160_v20 = vsel %vm64_vm0, %v156_v19, 0.0 }
 0x118   :  { %v157_v18 = vsel %vm64_vm0, %v155_v17, 0.0 }
 0x119   :  { %158 = vadd.xlane.f32.xlu0 %v157_v18 }
 0x11d   :  { %161 = vadd.xlane.f32.xlu0 %v160_v20 }
 0x1a6   :  { %v159_v23 = vpop.xlane.xlu0 %158 }
 0x1a7   :  { %v170_v24 = vadd.f32 %v289_v22, %v159_v23 }
 0x1a9   :  { %175 = vperm.xlu1 %321, %v170_v24  }
 0x1aa   :  { %v162_v25 = vpop.xlane.xlu0 %161 }
 0x1ab   :  { %v171_v26 = vadd.f32 %v289_v22, %v162_v25 }
 0x1ad   :  { %178 = vperm.xlu1 %321, %v171_v26  }
 0x228   :  { %v176_v30 = vpop.permute.xlu1 %175 }
 0x229   :  { %v185_v33 = vrot.slane %v176_v30, %v184_v31 }
 0x22c   :  { %v179_v32 = vpop.permute.xlu1 %178 }
 0x22d   :  { %v189_v34 = vrot.slane %v179_v32, %v184_v31 }
 0x22f   :  { %v191_v35 = vsel %vm190_vm1, %v189_v34, %v185_v33 }
 0x230   :  { %v194_v36 = vsel %vm193_vm2, %v191_v35, -inf }
 0x231   :  { %195 = vmax.xlane.f32.xlu0 %v194_v36 }
 0x2be   :  { %v196_v39 = vpop.xlane.xlu0 %195 }
 0x2bf   :  { %v201_v40 = vrot.slane %v196_v39, %v200_v37  ;;  %v205_v41 = vrot.slane %v196_v39, %v204_v38 }
 0x2c1   :  { %v208_v42 = vsub.f32 %v170_v24, %v201_v40  ;;  %v209_v43 = vsub.f32 %v171_v26, %v205_v41 }
 0x2c3   :  { %v210_v44 = vmul.f32 1.442695, %v208_v42  ;;  %v212_v45 = vmul.f32 1.442695, %v209_v43 }
 0x2c5   :  { %327 = vpow2.f32 %v210_v44 }
 0x2c6   :  { %329 = vpow2.f32 %v212_v45 }
 0x2cf   :  { %v328_v46 = vpop.eup %327 }
 0x2d0   :  { %v330_v47 = vpop.eup %329  ;;  %217 = vperm.xlu1 %321, %v328_v46  }
 0x2d1   :  { %220 = vperm.xlu0 %322, %v330_v47  }
 0x34f   :  { %v218_v48 = vpop.permute.xlu1 %217 }
 0x350   :  { %v221_v49 = vpop.permute.xlu0 %220  ;;  %v225_v50 = vrot.slane %v218_v48, %v184_v31 }
 0x351   :  { %v229_v51 = vrot.slane %v221_v49, %v184_v31 }
 0x353   :  { %v230_v52 = vsel %vm190_vm1, %v229_v51, %v225_v50 }
 0x354   :  { %v232_v53 = vsel %vm193_vm2, %v230_v52, 0.0 }
 0x355   :  { %233 = vadd.xlane.f32.xlu1 %v232_v53 }
 0x3e2   :  { %v234_v54 = vpop.xlane.xlu1 %233 }
 0x3e3   :  { %v239_v55 = vrot.slane %v234_v54, %v200_v37  ;;  %v243_v56 = vrot.slane %v234_v54, %v204_v38 }
 0x3e5   :  { %331 = vrcp.f32 %v239_v55 }
 0x3e6   :  { %333 = vrcp.f32 %v243_v56 }
 0x3ef   :  { %v332_v57 = vpop.eup %331 }
 0x3f0   :  { %v334_v58 = vpop.eup %333  ;;  %v247_v59 = vmul.f32 %v332_v57, %v328_v46 }
 0x3f1   :  { %v249_v60 = vmul.f32 %v334_v58, %v330_v47 }
 0x3f2   :  { %253 = vperm.xlu1 %321, %v247_v59  }
 0x3f3   :  { %256 = vperm.xlu0 %322, %v249_v60  }
 0x471   :  { %v254_v61 = vpop.permute.xlu1 %253 }
 0x472   :  { %v257_v62 = vpop.permute.xlu0 %256  ;;  %v261_v63 = vrot.slane %v254_v61, %v184_v31 }
 0x473   :  { %v265_v0 = vrot.slane %v257_v62, %v184_v31 }
 0x475   :  { %v266_v1 = vsel %vm190_vm1, %v265_v0, %v261_v63 }
 0x476   :  { %268 = vst.msk [vmem:[#allocation8] sm:$0x3] %vm193_vm2, %v266_v1 }
 0x477   :  { %390 = shalt.err (!%p387_p6)
}
 0x478   :  { %s391_s25 = scalar_lea.hbm %s503_s5, 32 }
 0x479   :  { %p392_p7 = scmp.ne.s32.totalorder %s503_s5, %s391_s25  ;;  %p395_p8 = scmp.lt.u32.totalorder %s391_s25, %s503_s5 }
 0x47b   :  { %p397_p9 = pnand %p395_p8, %p392_p7 }
 0x47d   :  { %400 = shalt.err (!%p397_p9)
}
 0x47e   :  { %278 = dma.vmem_to_hbm [thread:$0]  %s276_s3, 32, %s503_s5, [#allocation5]  }
 0x47f   :  { %405 = dma.done.wait [#allocation5], 32  }
 0x480   :  { %406 = vsyncadd [#allocation5], 4294967264 }
 0x481   :  { %282 = vsyncpa [#allocation4], 1 }
 0x482   :  { %283 = vsyncpa [#allocation7], 1 }
 0x483   :  { %284 = vsyncpa [#allocation5], 1 }

</bundles_post_ra>
